<compile_context>
chip_gen: v7x
topology: tpu7x:2x2x1
jax: 0.10.0
libtpu: 0.0.40
codegen_flags: <defaults>
</compile_context>

<pallas_src>
import functools

import jax
import jax.numpy as jnp
from jax.experimental import pallas as pl
from jax.experimental.pallas import tpu as pltpu


def _atten2_kernel(q_ref, k_ref, v_ref, wa_ref, wl_ref, bias_ref, out_ref,
                   *, B, T, Dq, V1, O):
    hi = jax.lax.Precision.HIGHEST

    q = q_ref[...]                                    # (B*T, Dq)
    k = k_ref[...]                                    # (B*T, Dk)
    ba = bias_ref[:, :V1]                             # (1, V1)
    bl = bias_ref[:, V1:]                             # (1, O)

    # logits = cat(Q, K) @ Wa + ba, as a split matmul over static Wa row-slices
    # (Dq is a multiple of 8 -> sublane-tile-aligned, zero-cost views).
    logits = (jnp.dot(q, wa_ref[:Dq, :], preferred_element_type=jnp.float32,
                      precision=hi)
              + jnp.dot(k, wa_ref[Dq:, :], preferred_element_type=jnp.float32,
                        precision=hi)
              + ba)                                   # (B*T, V1)

    # numerically stable softmax over last dim
    m = jnp.max(logits, axis=-1, keepdims=True)
    e = jnp.exp(logits - m)
    s = jnp.sum(e, axis=-1, keepdims=True)
    inv = pl.reciprocal(s, approx=True)               # EUP vrcp (off VALU path)
    inv = inv * (2.0 - s * inv)                       # one Newton step -> f32 accurate
    aw = e * inv                                      # (B*T, V1)

    # temp = atten_weight @ V, unrolled over the (static, tiny) batch dim.
    # Row slices at multiples of T=8 are sublane-tile aligned; v_ref[b] is a
    # free squeezed view.
    temp = jnp.concatenate(
        [jnp.dot(aw[b * T:(b + 1) * T, :], v_ref[b],
                 preferred_element_type=jnp.float32, precision=hi)
         for b in range(B)],
        axis=0)                                       # (B*T, V2)

    # result = cat(Q, temp) @ Wl + bl, split over static Wl row-slices.
    res = (jnp.dot(q, wl_ref[:Dq, :], preferred_element_type=jnp.float32,
                   precision=hi)
           + jnp.dot(temp, wl_ref[Dq:, :], preferred_element_type=jnp.float32,
                     precision=hi)
           + bl)                                      # (B*T, O)

    # Single packed output slab: [ result | atten_weight ].
    out_ref[...] = jnp.concatenate([res, aw], axis=-1).astype(out_ref.dtype)


@jax.jit
def my_atten2_forward(Q, K, V, Wa, ba, Wl, bl):
    """Q:(B,T,Dq) K:(B,T,Dk) V:(B,V1,V2); Wa:(Dq+Dk,V1) ba:(V1,) Wl:(Dq+V2,O) bl:(O,)"""
    B, T, Dq = Q.shape
    Dk = K.shape[-1]
    V1, V2 = V.shape[-2], V.shape[-1]
    O = Wl.shape[-1]
    BT = B * T

    # Wrapper-side glue is just metadata-level reshapes plus one tiny bias pack.
    Q2 = Q.reshape(BT, Dq)
    K2 = K.reshape(BT, Dk)
    bias = jnp.concatenate([ba, bl]).reshape(1, V1 + O)

    kernel = functools.partial(_atten2_kernel, B=B, T=T, Dq=Dq, V1=V1, O=O)

    flops = 2 * BT * ((Dq + Dk) * V1 + V1 * V2 + (Dq + V2) * O)
    transcendentals = BT * V1
    bytes_accessed = 4 * (BT * (Dq + Dk) + B * V1 * V2 + (Dq + Dk) * V1
                          + (Dq + V2) * O + (V1 + O) + BT * (O + V1))

    packed = pl.pallas_call(
        kernel,
        out_shape=jax.ShapeDtypeStruct((BT, O + V1), Q.dtype),
        in_specs=[pl.BlockSpec(memory_space=pltpu.MemorySpace.VMEM)] * 6,
        out_specs=pl.BlockSpec(memory_space=pltpu.MemorySpace.VMEM),
        cost_estimate=pl.CostEstimate(flops=flops,
                                      transcendentals=transcendentals,
                                      bytes_accessed=bytes_accessed),
    )(Q2, K2, V, Wa, Wl, bias)

    result = packed[:, :O].reshape(B, T, O)
    atten_weight = packed[:, O:].reshape(B, T, V1)
    return result, atten_weight


def _reference(Q, K, V, Wa, ba, Wl, bl):
    logits = jnp.concatenate([Q, K], axis=-1) @ Wa + ba
    aw = jax.nn.softmax(logits, axis=-1)
    temp = jnp.einsum("btv,bvd->btd", aw, V)
    res = jnp.concatenate([Q, temp], axis=-1) @ Wl + bl
    return res, aw


if __name__ == "__main__":
    # Module hyper-params (small, consistent with the tutorial forward).
    query_size, key_size = 32, 32
    value_size1, value_size2 = 32, 32
    output_size = 32
    B, T = 2, 8

    key = jax.random.PRNGKey(0)
    k_q, k_k, k_v, k_wa, k_ba, k_wl, k_bl = jax.random.split(key, 7)

    Q = jax.random.normal(k_q, (B, T, query_size), dtype=jnp.float32)
    K = jax.random.normal(k_k, (B, T, key_size), dtype=jnp.float32)
    V = jax.random.normal(k_v, (B, value_size1, value_size2), dtype=jnp.float32)

    # Deterministic parameter init (PyTorch-Linear-style uniform bounds),
    # stored as (in_features, out_features).
    lim_a = 1.0 / jnp.sqrt(query_size + key_size)
    Wa = jax.random.uniform(k_wa, (query_size + key_size, value_size1),
                            minval=-lim_a, maxval=lim_a, dtype=jnp.float32)
    ba = jax.random.uniform(k_ba, (value_size1,), minval=-lim_a, maxval=lim_a,
                            dtype=jnp.float32)
    lim_l = 1.0 / jnp.sqrt(query_size + value_size2)
    Wl = jax.random.uniform(k_wl, (query_size + value_size2, output_size),
                            minval=-lim_l, maxval=lim_l, dtype=jnp.float32)
    bl = jax.random.uniform(k_bl, (output_size,), minval=-lim_l, maxval=lim_l,
                            dtype=jnp.float32)

    result, atten_weight = my_atten2_forward(Q, K, V, Wa, ba, Wl, bl)
    jax.block_until_ready((result, atten_weight))

    ref_res, ref_aw = _reference(Q, K, V, Wa, ba, Wl, bl)
    assert jnp.allclose(result, ref_res, atol=1e-4, rtol=1e-4)
    assert jnp.allclose(atten_weight, ref_aw, atol=1e-5, rtol=1e-5)

    print("KERNEL_OK")
</pallas_src>

<mosaic_0001>
module attributes {stable_mosaic.version = 11 : i64} {
  func.func @_atten2_kernel(%arg0: memref<16x32xf32, #tpu.memory_space<vmem>>, %arg1: memref<16x32xf32, #tpu.memory_space<vmem>>, %arg2: memref<2x32x32xf32, #tpu.memory_space<vmem>>, %arg3: memref<64x32xf32, #tpu.memory_space<vmem>>, %arg4: memref<64x32xf32, #tpu.memory_space<vmem>>, %arg5: memref<1x64xf32, #tpu.memory_space<vmem>>, %arg6: memref<16x64xf32, #tpu.memory_space<vmem>>) attributes {dimension_semantics = [], scalar_prefetch = 0 : i64, scratch_operands = 0 : i64, tpu.core_type = #tpu.core_type<tc>} {
    %c0 = arith.constant 0 : index
    %c0_0 = arith.constant 0 : index
    %0 = vector.load %arg0[%c0, %c0_0] : memref<16x32xf32, #tpu.memory_space<vmem>>, vector<16x32xf32>
    %c0_1 = arith.constant 0 : index
    %c0_2 = arith.constant 0 : index
    %1 = vector.load %arg1[%c0_1, %c0_2] : memref<16x32xf32, #tpu.memory_space<vmem>>, vector<16x32xf32>
    %c0_3 = arith.constant 0 : index
    %c0_4 = arith.constant 0 : index
    %2 = vector.load %arg5[%c0_3, %c0_4] : memref<1x64xf32, #tpu.memory_space<vmem>>, vector<1x32xf32>
    %c0_5 = arith.constant 0 : index
    %c32 = arith.constant 32 : index
    %3 = vector.load %arg5[%c0_5, %c32] : memref<1x64xf32, #tpu.memory_space<vmem>>, vector<1x32xf32>
    %c0_6 = arith.constant 0 : index
    %c0_7 = arith.constant 0 : index
    %4 = vector.load %arg3[%c0_6, %c0_7] : memref<64x32xf32, #tpu.memory_space<vmem>>, vector<32x32xf32>
    %cst = arith.constant dense<0.000000e+00> : vector<16x32xf32>
    %5 = tpu.matmul %0, %4, %cst {dimension_numbers = #tpu.dot_dimension_numbers<[1], [0], [0], [1], [0, 0, 1, 1], [], []>, precision = #tpu.contract_precision<fp32>} : vector<16x32xf32>, vector<32x32xf32>, vector<16x32xf32> -> vector<16x32xf32>
    %c32_8 = arith.constant 32 : index
    %c0_9 = arith.constant 0 : index
    %6 = vector.load %arg3[%c32_8, %c0_9] : memref<64x32xf32, #tpu.memory_space<vmem>>, vector<32x32xf32>
    %cst_10 = arith.constant dense<0.000000e+00> : vector<16x32xf32>
    %7 = tpu.matmul %1, %6, %cst_10 {dimension_numbers = #tpu.dot_dimension_numbers<[1], [0], [0], [1], [0, 0, 1, 1], [], []>, precision = #tpu.contract_precision<fp32>} : vector<16x32xf32>, vector<32x32xf32>, vector<16x32xf32> -> vector<16x32xf32>
    %8 = arith.addf %5, %7 : vector<16x32xf32>
    %9 = vector.broadcast %2 : vector<1x32xf32> to vector<16x32xf32>
    %10 = arith.addf %8, %9 : vector<16x32xf32>
    %cst_11 = arith.constant dense<0xFF800000> : vector<16xf32>
    %11 = vector.multi_reduction <maximumf>, %10, %cst_11 [1] : vector<16x32xf32> to vector<16xf32>
    %12 = vector.shape_cast %11 : vector<16xf32> to vector<16x1xf32>
    %13 = vector.broadcast %12 : vector<16x1xf32> to vector<16x32xf32>
    %14 = arith.subf %10, %13 : vector<16x32xf32>
    %15 = math.exp %14 : vector<16x32xf32>
    %cst_12 = arith.constant dense<0.000000e+00> : vector<16xf32>
    %16 = vector.multi_reduction <add>, %15, %cst_12 [1] : vector<16x32xf32> to vector<16xf32>
    %17 = vector.shape_cast %16 : vector<16xf32> to vector<16x1xf32>
    %18 = tpu.reciprocal %17 {approx = true} : vector<16x1xf32> -> vector<16x1xf32>
    %19 = arith.mulf %17, %18 : vector<16x1xf32>
    %cst_13 = arith.constant 2.000000e+00 : f32
    %20 = vector.broadcast %cst_13 : f32 to vector<16x1xf32>
    %21 = arith.subf %20, %19 : vector<16x1xf32>
    %22 = arith.mulf %18, %21 : vector<16x1xf32>
    %23 = vector.broadcast %22 : vector<16x1xf32> to vector<16x32xf32>
    %24 = arith.mulf %15, %23 : vector<16x32xf32>
    %25 = vector.extract_strided_slice %24 {offsets = [0, 0], sizes = [8, 32], strides = [1, 1]} : vector<16x32xf32> to vector<8x32xf32>
    %c0_14 = arith.constant 0 : index
    %c0_15 = arith.constant 0 : index
    %c0_16 = arith.constant 0 : index
    %26 = vector.load %arg2[%c0_14, %c0_15, %c0_16] : memref<2x32x32xf32, #tpu.memory_space<vmem>>, vector<1x32x32xf32>
    %27 = vector.shape_cast %26 : vector<1x32x32xf32> to vector<32x32xf32>
    %cst_17 = arith.constant dense<0.000000e+00> : vector<8x32xf32>
    %28 = tpu.matmul %25, %27, %cst_17 {dimension_numbers = #tpu.dot_dimension_numbers<[1], [0], [0], [1], [0, 0, 1, 1], [], []>, precision = #tpu.contract_precision<fp32>} : vector<8x32xf32>, vector<32x32xf32>, vector<8x32xf32> -> vector<8x32xf32>
    %29 = vector.extract_strided_slice %24 {offsets = [8, 0], sizes = [8, 32], strides = [1, 1]} : vector<16x32xf32> to vector<8x32xf32>
    %c1 = arith.constant 1 : index
    %c0_18 = arith.constant 0 : index
    %c0_19 = arith.constant 0 : index
    %30 = vector.load %arg2[%c1, %c0_18, %c0_19] : memref<2x32x32xf32, #tpu.memory_space<vmem>>, vector<1x32x32xf32>
    %31 = vector.shape_cast %30 : vector<1x32x32xf32> to vector<32x32xf32>
    %cst_20 = arith.constant dense<0.000000e+00> : vector<8x32xf32>
    %32 = tpu.matmul %29, %31, %cst_20 {dimension_numbers = #tpu.dot_dimension_numbers<[1], [0], [0], [1], [0, 0, 1, 1], [], []>, precision = #tpu.contract_precision<fp32>} : vector<8x32xf32>, vector<32x32xf32>, vector<8x32xf32> -> vector<8x32xf32>
    %33 = tpu.concatenate %28, %32 in 0 : vector<8x32xf32>, vector<8x32xf32> -> vector<16x32xf32>
    %c0_21 = arith.constant 0 : index
    %c0_22 = arith.constant 0 : index
    %34 = vector.load %arg4[%c0_21, %c0_22] : memref<64x32xf32, #tpu.memory_space<vmem>>, vector<32x32xf32>
    %cst_23 = arith.constant dense<0.000000e+00> : vector<16x32xf32>
    %35 = tpu.matmul %0, %34, %cst_23 {dimension_numbers = #tpu.dot_dimension_numbers<[1], [0], [0], [1], [0, 0, 1, 1], [], []>, precision = #tpu.contract_precision<fp32>} : vector<16x32xf32>, vector<32x32xf32>, vector<16x32xf32> -> vector<16x32xf32>
    %c32_24 = arith.constant 32 : index
    %c0_25 = arith.constant 0 : index
    %36 = vector.load %arg4[%c32_24, %c0_25] : memref<64x32xf32, #tpu.memory_space<vmem>>, vector<32x32xf32>
    %cst_26 = arith.constant dense<0.000000e+00> : vector<16x32xf32>
    %37 = tpu.matmul %33, %36, %cst_26 {dimension_numbers = #tpu.dot_dimension_numbers<[1], [0], [0], [1], [0, 0, 1, 1], [], []>, precision = #tpu.contract_precision<fp32>} : vector<16x32xf32>, vector<32x32xf32>, vector<16x32xf32> -> vector<16x32xf32>
    %38 = arith.addf %35, %37 : vector<16x32xf32>
    %39 = vector.broadcast %3 : vector<1x32xf32> to vector<16x32xf32>
    %40 = arith.addf %38, %39 : vector<16x32xf32>
    %41 = tpu.concatenate %40, %24 in 1 : vector<16x32xf32>, vector<16x32xf32> -> vector<16x64xf32>
    %c0_27 = arith.constant 0 : index
    %c0_28 = arith.constant 0 : index
    %42 = vector.load %arg6[%c0_27, %c0_28] : memref<16x64xf32, #tpu.memory_space<vmem>>, vector<16x64xf32>
    tpu.vector_store %arg6[%c0_27, %c0_28], %41 {strides = array<i32>} : memref<16x64xf32, #tpu.memory_space<vmem>>, vector<16x64xf32>,
    return
  }
}

</mosaic_0001>

<bundles_post_ra>
// kernel: my_atten2_forward.1
= control target key start
LH: loop header
LB: loop body
LE: loop exit
PB: predicated region body
PF: predicated region fallthrough
CT: control target
= control target key end

     0   :  { %vm36_vm0 = vcmask 261120   ;;  %vm4163_vm1 = vmmov 0   ;;  %s4165_s27 = smov 32   ;;  %vm3209_vm2 = vcmask 523264   ;;  %s4576_s3 = inlined_call_operand.vmem [shape: f32[64,32], index: 3, kind: input, shape index: {}]   ;;  %s4577_s1 = inlined_call_operand.vmem [shape: f32[16,32], index: 1, kind: input, shape index: {}]   ;;  %s4578_s0 = inlined_call_operand.vmem [shape: f32[16,32], index: 0, kind: input, shape index: {}]   ;;  %s4579_s5 = inlined_call_operand.vmem [shape: f32[1,64], index: 5, kind: input, shape index: {}]   ;;  %s4580_s2 = inlined_call_operand.vmem [shape: f32[2,32,32], index: 2, kind: input, shape index: {}]   ;;  %s4581_s4 = inlined_call_operand.vmem [shape: f32[64,32], index: 4, kind: input, shape index: {}]   ;;  %s4582_s6 = inlined_call_operand.vmem [shape: f32[16,64], index: 6, kind: output, shape index: {}]  }
   0x1   :  { %v32_v0 = vld [vmem:[%s4576_s3 + $0x20] sm:$0xff]  ;;  %v33_v1 = vld [vmem:[%s4576_s3 + $0x28] sm:$0xff]  ;;  %v34_v7 = vld [vmem:[%s4576_s3 + $0x30] sm:$0xff] }
   0x2   :  { %v28_v2 = vld [vmem:[%s4576_s3] sm:$0xff]  ;;  %v44_v3 = vand.u32 4294901760, %v32_v0  ;;  %v47_v4 = vand.u32 4294901760, %v33_v1  ;;  %v29_v5 = vld [vmem:[%s4576_s3 + $0x8] sm:$0xff]  ;;  %v4220_v8 = vld [vmem:[%s4576_s3 + $0x38] sm:$0xff]  ;;  %v50_v10 = vand.u32 4294901760, %v34_v7 }
   0x3   :  { %v578_v6 = vand.u32 4294901760, %v28_v2  ;;  %v581_v9 = vand.u32 4294901760, %v29_v5  ;;  %v53_v11 = vand.u32 4294901760, %v4220_v8  ;;  %v4226_v12 = vld [vmem:[%s4576_s3 + $0x10] sm:$0xff]  ;;  %v4231_v13 = vld [vmem:[%s4576_s3 + $0x18] sm:$0xff]  ;;  %v25_v14 = vld [vmem:[%s4577_s1] sm:$0xff] }
   0x4   :  { %v4236_v15 = vpack.c.bf16 %v47_v4, %v44_v3  ;;  %v584_v16 = vand.u32 4294901760, %v4226_v12  ;;  %v587_v17 = vand.u32 4294901760, %v4231_v13  ;;  %v26_v18 = vld [vmem:[%s4577_s1 + $0x8] sm:$0xff]  ;;  %v38_v19 = vsel %vm36_vm0, %v25_v14, 0  ;;  %v23_v20 = vld [vmem:[%s4578_s0] sm:$0xff]  ;;  %s4166_s3 = smov 96  }
   0x5   :  { %v24_v21 = vld [vmem:[%s4578_s0 + $0x8] sm:$0xff]  ;;  %v4250_v22 = vpack.c.bf16 %v581_v9, %v578_v6  ;;  %v4254_v23 = vpack.c.bf16 %v53_v11, %v50_v10  ;;  %v4256_v24 = vand.u32 4294901760, %v38_v19  ;;  %v572_v25 = vsel %vm36_vm0, %v23_v20, 0 }
   0x6   :  { %3822 = vmatprep.subr.bf16.mxu1 %v4236_v15  ;;  %v4260_v26 = vpack.c.bf16 %v587_v17, %v584_v16  ;;  %v4262_v27 = vand.u32 4294901760, %v572_v25  ;;  %v41_v28 = vsel %vm36_vm0, %v26_v18, 0  ;;  %v4265_v29 = vsub.f32 %v32_v0, %v44_v3 }
   0x7   :  { %3870 = vmatprep.subr.bf16.mxu0 %v4250_v22  ;;  %3824 = vmatpush3.bf16.msra.mxu1 %v4236_v15  ;;  %v4270_v30 = vsub.f32 %v38_v19, %v4256_v24  ;;  %v4272_v31 = vand.u32 4294901760, %v41_v28  ;;  %v4274_v32 = vsub.f32 %v33_v1, %v47_v4  ;;  %v575_v33 = vsel %vm36_vm0, %v24_v21, 0 }
   0x8   :  { %3872 = vmatpush3.bf16.msra.mxu0 %v4250_v22  ;;  %3826 = vmatprep.subr.bf16.mxu1 %v4254_v23  ;;  %v4280_v34 = vsub.f32 %v572_v25, %v4262_v27  ;;  %v135_v35 = vand.u32 4294901760, %v4265_v29  ;;  %v4283_v36 = vand.u32 4294901760, %v575_v33  ;;  %v4285_v37 = vsub.f32 %v28_v2, %v578_v6 }
   0x9   :  { %3874 = vmatprep.subr.bf16.mxu0 %v4260_v26  ;;  %v114_v38 = vand.u32 4294901760, %v4270_v30  ;;  %v4290_v39 = vsub.f32 %v41_v28, %v4272_v31  ;;  %v142_v40 = vand.u32 4294901760, %v4274_v32  ;;  %v4293_v41 = vsub.f32 %v29_v5, %v581_v9 }
   0xa   :  { %v4296_v42 = vand.u32 4294901760, %v4280_v34  ;;  %v136_v43 = vsub.f32 %v4265_v29, %v135_v35  ;;  %v4302_v44 = vsub.f32 %v575_v33, %v4283_v36  ;;  %v669_v45 = vand.u32 4294901760, %v4285_v37 }
   0xb   :  { %3828 = vmatpush3.bf16.msra.mxu1 %v4254_v23  ;;  %v115_v46 = vsub.f32 %v4270_v30, %v114_v38  ;;  %v124_v47 = vand.u32 4294901760, %v4290_v39  ;;  %v143_v48 = vsub.f32 %v4274_v32, %v142_v40  ;;  %v676_v49 = vand.u32 4294901760, %v4293_v41 }
   0xc   :  { %3876 = vmatpush3.bf16.msra.mxu0 %v4260_v26  ;;  %v649_v50 = vsub.f32 %v4280_v34, %v4296_v42  ;;  %v137_v51 = vand.u32 4294901760, %v136_v43  ;;  %v4318_v52 = vand.u32 4294901760, %v4302_v44  ;;  %v670_v53 = vsub.f32 %v4285_v37, %v669_v45 }
   0xd   :  { %v116_v54 = vand.u32 4294901760, %v115_v46  ;;  %v125_v55 = vsub.f32 %v4290_v39, %v124_v47  ;;  %v144_v56 = vand.u32 4294901760, %v143_v48  ;;  %v677_v57 = vsub.f32 %v4293_v41, %v676_v49 }
   0xe   :  { %v4329_v58 = vand.u32 4294901760, %v649_v50  ;;  %v659_v59 = vsub.f32 %v4302_v44, %v4318_v52  ;;  %v671_v60 = vand.u32 4294901760, %v670_v53  ;;  %v4333_v61 = vsub.f32 %v34_v7, %v50_v10 }
   0xf   :  { %3433 = vmatprep.mubr.f32.mxu1 %v116_v54  ;;  %v126_v62 = vand.u32 4294901760, %v125_v55  ;;  %v3829_v63 = vpack.c.bf16 %v144_v56, %v137_v51  ;;  %v678_v0 = vand.u32 4294901760, %v677_v57  ;;  %v4338_v1 = vsub.f32 %v4220_v8, %v53_v11  ;;  %v1141_v55 = vld [vmem:[%s4580_s2] sm:$0xff]  ;;  %v1142_v56 = vld [vmem:[%s4580_s2 + $0x8] sm:$0xff] }
  0x10   :  { %3499 = vmatprep.mubr.f32.mxu0 %v4329_v58  ;;  %v4341_v2 = vand.u32 4294901760, %v659_v59  ;;  %v149_v3 = vand.u32 4294901760, %v4333_v61  ;;  %v682_v4 = vsub.f32 %v4226_v12, %v584_v16  ;;  %v689_v5 = vsub.f32 %v4231_v13, %v587_v17 }
  0x11   :  { %3434 = vmatmul.mubr.f32.vlgmr.msra.gmra.mrb[0].mxu1 %v126_v62  ;;  %3830 = vmatprep.subr.bf16.mxu1 %v3829_v63  ;;  %v3877_v6 = vpack.c.bf16 %v678_v0, %v671_v60  ;;  %v156_v7 = vand.u32 4294901760, %v4338_v1  ;;  %v3837_v20 = vpack.c.bf16 %v4274_v32, %v4265_v29  ;;  %v3885_v25 = vpack.c.bf16 %v4293_v41, %v4285_v37  ;;  %v1143_v0 = vld [vmem:[%s4580_s2 + $0x10] sm:$0xff] }
  0x12   :  { %3500 = vmatmul.mubr.f32.vlgmr.msra.gmra.mrb[0].mxu0 %v4341_v2  ;;  %3832 = vmatpush3.bf16.msra.mxu1 %v3829_v63  ;;  %v150_v8 = vsub.f32 %v4333_v61, %v149_v3  ;;  %v683_v9 = vand.u32 4294901760, %v682_v4  ;;  %v690_v10 = vand.u32 4294901760, %v689_v5  ;;  %v3841_v28 = vpack.c.bf16 %v4338_v1, %v4333_v61 }
  0x13   :  { %3878 = vmatprep.subr.bf16.mxu0 %v3877_v6  ;;  %v157_v11 = vsub.f32 %v4338_v1, %v156_v7  ;;  %3444 = vmatprep.mubr.f32.mxu1 %v4256_v24  ;;  %v3889_v33 = vpack.c.bf16 %v689_v5, %v682_v4  ;;  %v3853_v43 = vpack.c.bf16 %v142_v40, %v135_v35  ;;  %v1149_v57 = vand.u32 4294901760, %v1141_v55  ;;  %v1144_v1 = vld [vmem:[%s4580_s2 + $0x18] sm:$0xff] }
  0x14   :  { %3880 = vmatpush3.bf16.msra.mxu0 %v3877_v6  ;;  %v151_v12 = vand.u32 4294901760, %v150_v8  ;;  %v684_v13 = vsub.f32 %v682_v4, %v683_v9  ;;  %v691_v14 = vsub.f32 %v689_v5, %v690_v10  ;;  %3510 = vmatprep.mubr.f32.mxu0 %v4262_v27  ;;  %v3901_v46 = vpack.c.bf16 %v676_v49, %v669_v45 }
  0x15   :  { %v158_v16 = vand.u32 4294901760, %v157_v11  ;;  %v3857_v29 = vpack.c.bf16 %v156_v7, %v149_v3  ;;  %v3905_v32 = vpack.c.bf16 %v690_v10, %v683_v9  ;;  %v1152_v59 = vand.u32 4294901760, %v1142_v56 }
  0x16   :  { %v685_v17 = vand.u32 4294901760, %v684_v13  ;;  %v692_v18 = vand.u32 4294901760, %v691_v14  ;;  %v4421_v61 = vsub.f32 %v1141_v55, %v1149_v57  ;;  %v4162_v63 = vmov 0.0|0.0  }
  0x17   :  { %v3833_v19 = vpack.c.bf16 %v158_v16, %v151_v12  ;;  %v4419_v60 = vpack.c.bf16 %v1152_v59, %v1149_v57  ;;  %v4423_v62 = vsub.f32 %v1142_v56, %v1152_v59  ;;  %v1155_v3 = vand.u32 4294901760, %v1143_v0  ;;  %v3219_v56 = vld [vmem:[%s4580_s2 + $0x30] sm:$0xff]  ;;  %v3220_v57 = vld [vmem:[%s4580_s2 + $0x38] sm:$0xff] }
  0x18   :  { %v3881_v21 = vpack.c.bf16 %v692_v18, %v685_v17  ;;  %v1158_v4 = vand.u32 4294901760, %v1144_v1  ;;  %v1230_v5 = vand.u32 4294901760, %v4421_v61  ;;  %v4164_v13 = vmov 0.0  }
  0x19   :  { %3834 = vmatprep.subr.bf16.mxu1 %v3833_v19  ;;  %v1237_v6 = vand.u32 4294901760, %v4423_v62  ;;  %v1243_v8 = vsub.f32 %v1143_v0, %v1155_v3  ;;  %v1648_v0 = vand.u32 4294901760, %v3219_v56 }
  0x1a   :  { %3882 = vmatprep.subr.bf16.mxu0 %v3881_v21  ;;  %3836 = vmatpush3.bf16.msra.mxu1 %v3833_v19  ;;  %v4436_v7 = vpack.c.bf16 %v1158_v4, %v1155_v3  ;;  %v1250_v9 = vsub.f32 %v1144_v1, %v1158_v4  ;;  %v1231_v10 = vsub.f32 %v4421_v61, %v1230_v5  ;;  %v1651_v1 = vand.u32 4294901760, %v3220_v57 }
  0x1b   :  { %3884 = vmatpush3.bf16.msra.mxu0 %v3881_v21  ;;  %3838 = vmatprep.subr.bf16.mxu1 %v3837_v20  ;;  %v1238_v11 = vsub.f32 %v4423_v62, %v1237_v6  ;;  %v1244_v16 = vand.u32 4294901760, %v1243_v8  ;;  %v1736_v4 = vsub.f32 %v3219_v56, %v1648_v0 }
  0x1c   :  { %3886 = vmatprep.subr.bf16.mxu0 %v3885_v25  ;;  %v1232_v12 = vand.u32 4294901760, %v1231_v10  ;;  %v1251_v17 = vand.u32 4294901760, %v1250_v9 }
  0x1d   :  { %3445 = vmatmul.mubr.f32.vlgmr.msra.gmra.mrb[0].mxu1 %v4272_v31  ;;  %v1239_v14 = vand.u32 4294901760, %v1238_v11  ;;  %v1245_v19 = vsub.f32 %v1243_v8, %v1244_v16 }
  0x1e   :  { %3511 = vmatmul.mubr.f32.vlgmr.msra.gmra.mrb[0].mxu0 %v4283_v36  ;;  %3840 = vmatpush3.bf16.msra.mxu1 %v3837_v20  ;;  %v1252_v20 = vsub.f32 %v1250_v9, %v1251_v17 }
  0x1f   :  { %3888 = vmatpush3.bf16.msra.mxu0 %v3885_v25  ;;  %3842 = vmatprep.subr.bf16.mxu1 %v3841_v28  ;;  %v3924_v18 = vpack.c.bf16 %v1239_v14, %v1232_v12  ;;  %v1246_v21 = vand.u32 4294901760, %v1245_v19  ;;  %v1737_v14 = vand.u32 4294901760, %v1736_v4 }
  0x20   :  { %3890 = vmatprep.subr.bf16.mxu0 %v3889_v33  ;;  %3455 = vmatprep.mubr.f32.mxu1 %v4270_v30  ;;  %v1253_v25 = vand.u32 4294901760, %v1252_v20 }
  0x21   :  { %3521 = vmatprep.mubr.f32.mxu0 %v4280_v34  ;;  %v1738_v20 = vsub.f32 %v1736_v4, %v1737_v14 }
  0x22   :  { %3844 = vmatpush3.bf16.msra.mxu1 %v3841_v28  ;;  %v3927_v28 = vpack.c.bf16 %v1253_v25, %v1246_v21 }
  0x23   :  { %3892 = vmatpush3.bf16.msra.mxu0 %v3889_v33  ;;  %3846 = vmatprep.subr.bf16.mxu1 %v4236_v15  ;;  %v3930_v33 = vpack.c.bf16 %v4423_v62, %v4421_v61 }
  0x24   :  { %3894 = vmatprep.subr.bf16.mxu0 %v4250_v22 }
  0x25   :  { %3456 = vmatmul.mubr.f32.vlgmr.msra.gmra.mrb[0].mxu1 %v4290_v39 }
  0x26   :  { %3522 = vmatmul.mubr.f32.vlgmr.msra.gmra.mrb[0].mxu0 %v4302_v44  ;;  %3848 = vmatpush3.bf16.msra.mxu1 %v4236_v15 }
  0x27   :  { %3896 = vmatpush3.bf16.msra.mxu0 %v4250_v22  ;;  %3850 = vmatprep.subr.bf16.mxu1 %v4254_v23 }
  0x28   :  { %3898 = vmatprep.subr.bf16.mxu0 %v4260_v26  ;;  %3466 = vmatprep.mubr.f32.mxu1 %v114_v38  ;;  %v4405_v38 = vld [vmem:[%s4579_s5] ss:$0 sm:$0xff] }
  0x29   :  { %3532 = vmatprep.mubr.f32.mxu0 %v4296_v42 }
  0x2a   :  { %3852 = vmatpush3.bf16.msra.mxu1 %v4254_v23 }
  0x2b   :  { %3900 = vmatpush3.bf16.msra.mxu0 %v4260_v26  ;;  %3854 = vmatprep.subr.bf16.mxu1 %v3853_v43 }
  0x2c   :  { %3902 = vmatprep.subr.bf16.mxu0 %v3901_v46 }
  0x2d   :  { %3467 = vmatmul.mubr.f32.vlgmr.msra.gmra.mrb[0].mxu1 %v124_v47 }
  0x2e   :  { %3533 = vmatmul.mubr.f32.vlgmr.msra.gmra.mrb[0].mxu0 %v4318_v52  ;;  %3856 = vmatpush3.bf16.msra.mxu1 %v3853_v43  ;;  %v3933_v43 = vpack.c.bf16 %v1250_v9, %v1243_v8 }
  0x2f   :  { %3904 = vmatpush3.bf16.msra.mxu0 %v3901_v46  ;;  %3858 = vmatprep.subr.bf16.mxu1 %v3857_v29  ;;  %v3942_v46 = vpack.c.bf16 %v1237_v6, %v1230_v5  ;;  %v1743_v5 = vsub.f32 %v3220_v57, %v1651_v1 }
  0x30   :  { %3906 = vmatprep.subr.bf16.mxu0 %v3905_v32  ;;  %3477 = vmatprep.mubr.f32.mxu1 %v4256_v24 }
  0x31   :  { %3543 = vmatprep.mubr.f32.mxu0 %v4262_v27 }
  0x32   :  { %3860 = vmatpush3.bf16.msra.mxu1 %v3857_v29  ;;  %v3945_v29 = vpack.c.bf16 %v1251_v17, %v1244_v16  ;;  %v1744_v16 = vand.u32 4294901760, %v1743_v5  ;;  %v3957_v17 = vpack.c.bf16 %v1651_v1, %v1648_v0 }
  0x33   :  { %3908 = vmatpush3.bf16.msra.mxu0 %v3905_v32  ;;  %3862 = vmatprep.subr.bf16.mxu1 %v4236_v15 }
  0x34   :  { %3910 = vmatprep.subr.bf16.mxu0 %v4250_v22  ;;  %v1745_v21 = vsub.f32 %v1743_v5, %v1744_v16 }
  0x35   :  { %3478 = vmatmul.mubr.f32.vlgmr.msra.gmra.mrb[0].mxu1 %v4272_v31 }
  0x36   :  { %3544 = vmatmul.mubr.f32.vlgmr.msra.gmra.mrb[0].mxu0 %v4283_v36  ;;  %3864 = vmatpush3.bf16.msra.mxu1 %v4236_v15 }
  0x37   :  { %3912 = vmatpush3.bf16.msra.mxu0 %v4250_v22  ;;  %3866 = vmatprep.subr.bf16.mxu1 %v4254_v23 }
  0x38   :  { %3914 = vmatprep.subr.bf16.mxu0 %v4260_v26  ;;  %3488 = vmatprep.mubr.f32.mxu1 %v4256_v24 }
  0x39   :  { %3554 = vmatprep.mubr.f32.mxu0 %v4262_v27 }
  0x3a   :  { %3868 = vmatpush3.bf16.msra.mxu1 %v4254_v23 }
  0x3b   :  { %3916 = vmatpush3.bf16.msra.mxu0 %v4260_v26  ;;  %3917 = vmatprep.subr.bf16.mxu1 %v4162_v63 }
  0x3d   :  { %3489 = vmatmul.mubr.f32.vlgmr.msra.gmra.mrb[0].mxu1 %v4272_v31 }
  0x3e   :  { %3555 = vmatmul.mubr.f32.vlgmr.msra.gmra.mrb[0].mxu0 %v4283_v36  ;;  %3919 = vmatpush3.bf16.msra.mxu1 %v4419_v60 }
  0x3f   :  { %3920 = vmatprep.subr.bf16.mxu1 %v4162_v63  ;;  %3565 = vmatprep.mubr.msk.f32.mxu1 %vm4163_vm1, %v4164_v13 }
  0x42   :  { %3922 = vmatpush3.bf16.msra.mxu1 %v4436_v7 }
  0x43   :  { %3923 = vmatprep.subr.bf16.mxu1 %v4162_v63 }
 0x110   :  { %v3490_v30 = vpop.f32.mrb[0].mxu1 }
 0x111   :  { %v3556_v15 = vpop.f32.mrb[0].mxu0  ;;  %v561_v35 = vpop.f32.mrb[1].mxu1 }
 0x112   :  { %v4085_v22 = vadd.f32 %v3556_v15, %v3490_v30  ;;  %v1095_v37 = vpop.f32.mrb[1].mxu0 }
 0x113   :  { %v4086_v24 = vadd.f32 %v1095_v37, %v561_v35 }
 0x114   :  { %v1112_v26 = vadd.f32 %v4085_v22, %v4405_v38 }
 0x115   :  { %v1111_v39 = vadd.f32 %v4086_v24, %v4405_v38 }
 0x116   :  { %v1116_v31 = vsel %vm36_vm0, %v1112_v26, -inf }
 0x117   :  { %v1113_v23 = vsel %vm36_vm0, %v1111_v39, -inf }
 0x118   :  { %1114 = vmax.xlane.f32.xlu0 %v1113_v23 }
 0x11c   :  { %1117 = vmax.xlane.f32.xlu0 %v1116_v31 }
 0x132   :  { %3196 = vrot.lane.b32.xlu0 %v4405_v38, %s4166_s3  ;;  %v2126_v38 = vld [vmem:[%s4581_s4] sm:$0xff] }
 0x1a5   :  { %v1115_v40 = vpop.xlane.xlu0 %1114 }
 0x1a6   :  { %v1119_v41 = vsub.f32 %v1111_v39, %v1115_v40 }
 0x1a8   :  { %v1121_v45 = vmul.f32 1.442695, %v1119_v41 }
 0x1a9   :  { %v1118_v47 = vpop.xlane.xlu0 %1117 }
 0x1aa   :  { %4154 = vpow2.f32 %v1121_v45  ;;  %v1120_v48 = vsub.f32 %v1112_v26, %v1118_v47 }
 0x1ac   :  { %v1123_v49 = vmul.f32 1.442695, %v1120_v48 }
 0x1ae   :  { %4156 = vpow2.f32 %v1123_v49 }
 0x1b4   :  { %v4155_v50 = vpop.eup %4154 }
 0x1b5   :  { %v1125_v51 = vsel %vm36_vm0, %v4155_v50, 0.0 }
 0x1b6   :  { %1126 = vadd.xlane.f32.xlu1 %v1125_v51 }
 0x1b8   :  { %v4157_v53 = vpop.eup %4156 }
 0x1b9   :  { %v1128_v54 = vsel %vm36_vm0, %v4157_v53, 0.0 }
 0x1ba   :  { %1129 = vadd.xlane.f32.xlu1 %v1128_v54 }
 0x243   :  { %v1127_v32 = vpop.xlane.xlu1 %1126 }
 0x244   :  { %4158 = vrcp.f32 %v1127_v32 }
 0x247   :  { %v1130_v30 = vpop.xlane.xlu1 %1129 }
 0x248   :  { %4160 = vrcp.f32 %v1130_v30 }
 0x24e   :  { %v4159_v15 = vpop.eup %4158 }
 0x24f   :  { %v1133_v35 = vmul.f32 %v4159_v15, %v1127_v32  ;;  %v3969_v32 = vpack.c.bf16 %v1743_v5, %v1736_v4 }
 0x251   :  { %v1135_v22 = vsub.f32 2.0, %v1133_v35  ;;  %v2130_v35 = vld [vmem:[%s4581_s4 + $0x20] sm:$0xff] }
 0x252   :  { %v4161_v37 = vpop.eup %4160 }
 0x253   :  { %v1137_v24 = vmul.f32 %v4159_v15, %v1135_v22  ;;  %v1134_v39 = vmul.f32 %v4161_v37, %v1130_v30  ;;  %v3981_v15 = vpack.c.bf16 %v1744_v16, %v1737_v14  ;;  %v2131_v22 = vld [vmem:[%s4581_s4 + $0x28] sm:$0xff] }
 0x255   :  { %v1136_v23 = vsub.f32 2.0, %v1134_v39  ;;  %v1139_v26 = vmul.f32 %v4155_v50, %v1137_v24  ;;  %v3217_v50 = vld [vmem:[%s4580_s2 + $0x20] sm:$0xff]  ;;  %v2144_v24 = vand.u32 4294901760, %v2131_v22 }
 0x256   :  { %v1642_v54 = vand.u32 4294901760, %v3217_v50 }
 0x257   :  { %v1138_v31 = vmul.f32 %v4161_v37, %v1136_v23  ;;  %v1146_v40 = vsel %vm36_vm0, %v1139_v26, 0  ;;  %3201 = vrot.lane.b32.xlu1 %v1139_v26, %s4165_s27  ;;  %v2141_v37 = vand.u32 4294901760, %v2130_v35  ;;  %v2238_v26 = vsub.f32 %v2131_v22, %v2144_v24 }
 0x258   :  { %v1217_v41 = vand.u32 4294901760, %v1146_v40  ;;  %v1722_v61 = vsub.f32 %v3217_v50, %v1642_v54 }
 0x259   :  { %v1140_v45 = vmul.f32 %v4157_v53, %v1138_v31  ;;  %v3218_v53 = vld [vmem:[%s4580_s2 + $0x28] sm:$0xff]  ;;  %v4519_v39 = vpack.c.bf16 %v2144_v24, %v2141_v37  ;;  %v2231_v23 = vsub.f32 %v2130_v35, %v2141_v37 }
 0x25a   :  { %v1218_v47 = vsub.f32 %v1146_v40, %v1217_v41  ;;  %v1645_v55 = vand.u32 4294901760, %v3218_v53  ;;  %v1723_v6 = vand.u32 4294901760, %v1722_v61 }
 0x25b   :  { %3203 = vrot.lane.b32.xlu1 %v1140_v45, %s4165_s27  ;;  %v1639_v59 = vsel %vm36_vm0, %v1140_v45, 0  ;;  %3990 = vmatprep.subr.bf16.mxu0 %v4519_v39  ;;  %v2239_v45 = vand.u32 4294901760, %v2238_v26 }
 0x25c   :  { %v1219_v48 = vand.u32 4294901760, %v1218_v47  ;;  %v1729_v62 = vsub.f32 %v3218_v53, %v1645_v55  ;;  %v4477_v3 = vand.u32 4294901760, %v1639_v59  ;;  %v3954_v10 = vpack.c.bf16 %v1645_v55, %v1642_v54  ;;  %3992 = vmatpush3.bf16.msra.mxu0 %v4519_v39 }
 0x25d   :  { %v1724_v11 = vsub.f32 %v1722_v61, %v1723_v6 }
 0x25e   :  { %v1220_v49 = vsub.f32 %v1218_v47, %v1219_v48  ;;  %v1730_v8 = vand.u32 4294901760, %v1729_v62  ;;  %v1711_v9 = vsub.f32 %v1639_v59, %v4477_v3 }
 0x260   :  { %v1221_v51 = vand.u32 4294901760, %v1220_v49  ;;  %v1731_v12 = vsub.f32 %v1729_v62, %v1730_v8  ;;  %v3978_v30 = vpack.c.bf16 %v1730_v8, %v1723_v6  ;;  %v2240_v49 = vsub.f32 %v2238_v26, %v2239_v45 }
 0x262   :  { %3566 = vmatmul.mubr.f32.vlgmr.msra.gmra.mrb[2].mxu1 %v1221_v51  ;;  %v1732_v19 = vand.u32 4294901760, %v1731_v12  ;;  %v2241_v54 = vand.u32 4294901760, %v2240_v49 }
 0x263   :  { %3925 = vmatpush3.bf16.msra.mxu1 %v3924_v18  ;;  %3576 = vmatprep.mubr.msk.f32.mxu1 %vm4163_vm1, %v4164_v13  ;;  %v1725_v18 = vand.u32 4294901760, %v1724_v11 }
 0x264   :  { %3926 = vmatprep.subr.bf16.mxu1 %v4162_v63 }
 0x265   :  { %v3960_v25 = vpack.c.bf16 %v1732_v19, %v1725_v18 }
 0x267   :  { %3928 = vmatpush3.bf16.msra.mxu1 %v3927_v28  ;;  %v1739_v28 = vand.u32 4294901760, %v1738_v20 }
 0x268   :  { %3929 = vmatprep.subr.bf16.mxu1 %v4162_v63 }
 0x26a   :  { %3577 = vmatmul.mubr.f32.vlgmr.msra.gmra.mrb[2].mxu1 %v1217_v41 }
 0x26b   :  { %3931 = vmatpush3.bf16.msra.mxu1 %v3930_v33  ;;  %3587 = vmatprep.mubr.msk.f32.mxu1 %vm4163_vm1, %v4164_v13  ;;  %v1746_v33 = vand.u32 4294901760, %v1745_v21 }
 0x26c   :  { %3932 = vmatprep.subr.bf16.mxu1 %v4162_v63 }
 0x26f   :  { %3934 = vmatpush3.bf16.msra.mxu1 %v3933_v43 }
 0x270   :  { %3935 = vmatprep.subr.bf16.mxu1 %v4162_v63 }
 0x272   :  { %3588 = vmatmul.mubr.f32.vlgmr.msra.gmra.mrb[2].mxu1 %v1218_v47 }
 0x273   :  { %3937 = vmatpush3.bf16.msra.mxu1 %v4419_v60  ;;  %3598 = vmatprep.mubr.msk.f32.mxu1 %vm4163_vm1, %v4164_v13 }
 0x274   :  { %3938 = vmatprep.subr.bf16.mxu1 %v4162_v63 }
 0x277   :  { %3940 = vmatpush3.bf16.msra.mxu1 %v4436_v7 }
 0x278   :  { %3941 = vmatprep.subr.bf16.mxu1 %v4162_v63 }
 0x27a   :  { %3599 = vmatmul.mubr.f32.vlgmr.msra.gmra.mrb[2].mxu1 %v1219_v48 }
 0x27b   :  { %3943 = vmatpush3.bf16.msra.mxu1 %v3942_v46  ;;  %3609 = vmatprep.mubr.msk.f32.mxu1 %vm4163_vm1, %v4164_v13  ;;  %v3963_v46 = vpack.c.bf16 %v1746_v33, %v1739_v28  ;;  %v2127_v33 = vld [vmem:[%s4581_s4 + $0x8] sm:$0xff] }
 0x27c   :  { %3944 = vmatprep.subr.bf16.mxu1 %v4162_v63 }
 0x27f   :  { %3946 = vmatpush3.bf16.msra.mxu1 %v3945_v29  ;;  %v3966_v29 = vpack.c.bf16 %v1729_v62, %v1722_v61 }
 0x280   :  { %3947 = vmatprep.subr.bf16.mxu1 %v4162_v63 }
 0x282   :  { %3610 = vmatmul.mubr.f32.vlgmr.msra.gmra.mrb[2].mxu1 %v1217_v41 }
 0x283   :  { %3949 = vmatpush3.bf16.msra.mxu1 %v4419_v60  ;;  %3620 = vmatprep.mubr.msk.f32.mxu1 %vm4163_vm1, %v4164_v13  ;;  %v1712_v60 = vand.u32 4294901760, %v1711_v9 }
 0x284   :  { %3950 = vmatprep.subr.bf16.mxu1 %v4162_v63 }
 0x287   :  { %3952 = vmatpush3.bf16.msra.mxu1 %v4436_v7  ;;  %v1713_v7 = vsub.f32 %v1711_v9, %v1712_v60 }
 0x288   :  { %3953 = vmatprep.subr.bf16.mxu1 %v4162_v63 }
 0x289   :  { %v1714_v43 = vand.u32 4294901760, %v1713_v7 }
 0x28a   :  { %3621 = vmatmul.mubr.f32.vlgmr.msra.gmra.mrb[2].mxu1 %v1217_v41  ;;  %v2232_v41 = vand.u32 4294901760, %v2231_v23 }
 0x28b   :  { %3955 = vmatpush3.bf16.msra.mxu1 %v3954_v10  ;;  %3631 = vmatprep.mubr.msk.f32.mxu1 %vm4163_vm1, %v4164_v13 }
 0x28c   :  { %3956 = vmatprep.subr.bf16.mxu1 %v4162_v63  ;;  %v2233_v48 = vsub.f32 %v2231_v23, %v2232_v41  ;;  %v4021_v5 = vpack.c.bf16 %v2239_v45, %v2232_v41 }
 0x28e   :  { %v2234_v53 = vand.u32 4294901760, %v2233_v48 }
 0x28f   :  { %3958 = vmatpush3.bf16.msra.mxu1 %v3957_v17 }
 0x290   :  { %3959 = vmatprep.subr.bf16.mxu1 %v4162_v63  ;;  %v3997_v57 = vpack.c.bf16 %v2241_v54, %v2234_v53 }
 0x292   :  { %3632 = vmatmul.mubr.f32.vlgmr.msra.gmra.mrb[4].mxu1 %v1714_v43  ;;  %v2669_v43 = vand.u32 4294901760, %v2126_v38 }
 0x293   :  { %3961 = vmatpush3.bf16.msra.mxu1 %v3960_v25  ;;  %3642 = vmatprep.mubr.msk.f32.mxu1 %vm4163_vm1, %v4164_v13 }
 0x294   :  { %3962 = vmatprep.subr.bf16.mxu1 %v4162_v63  ;;  %v2759_v35 = vsub.f32 %v2126_v38, %v2669_v43 }
 0x296   :  { %v2760_v37 = vand.u32 4294901760, %v2759_v35 }
 0x297   :  { %3964 = vmatpush3.bf16.msra.mxu1 %v3963_v46  ;;  %v2672_v46 = vand.u32 4294901760, %v2127_v33 }
 0x298   :  { %3965 = vmatprep.subr.bf16.mxu1 %v4162_v63 }
 0x299   :  { %v2766_v22 = vsub.f32 %v2127_v33, %v2672_v46 }
 0x29a   :  { %3643 = vmatmul.mubr.f32.vlgmr.msra.gmra.mrb[4].mxu1 %v4477_v3 }
 0x29b   :  { %3967 = vmatpush3.bf16.msra.mxu1 %v3966_v29  ;;  %3653 = vmatprep.mubr.msk.f32.mxu1 %vm4163_vm1, %v4164_v13  ;;  %v2128_v29 = vld [vmem:[%s4581_s4 + $0x10] sm:$0xff]  ;;  %v2767_v24 = vand.u32 4294901760, %v2766_v22 }
 0x29c   :  { %3968 = vmatprep.subr.bf16.mxu1 %v4162_v63 }
 0x29f   :  { %3970 = vmatpush3.bf16.msra.mxu1 %v3969_v32  ;;  %v2129_v32 = vld [vmem:[%s4581_s4 + $0x18] sm:$0xff] }
 0x2a0   :  { %3971 = vmatprep.subr.bf16.mxu1 %v4162_v63 }
 0x2a2   :  { %3654 = vmatmul.mubr.f32.vlgmr.msra.gmra.mrb[4].mxu1 %v1711_v9 }
 0x2a3   :  { %3973 = vmatpush3.bf16.msra.mxu1 %v3954_v10  ;;  %3664 = vmatprep.mubr.msk.f32.mxu1 %vm4163_vm1, %v4164_v13 }
 0x2a4   :  { %3974 = vmatprep.subr.bf16.mxu1 %v4162_v63 }
 0x2a7   :  { %3976 = vmatpush3.bf16.msra.mxu1 %v3957_v17 }
 0x2a8   :  { %3977 = vmatprep.subr.bf16.mxu1 %v4162_v63 }
 0x2aa   :  { %3665 = vmatmul.mubr.f32.vlgmr.msra.gmra.mrb[4].mxu1 %v1712_v60 }
 0x2ab   :  { %3979 = vmatpush3.bf16.msra.mxu1 %v3978_v30  ;;  %3675 = vmatprep.mubr.msk.f32.mxu1 %vm4163_vm1, %v4164_v13  ;;  %v2675_v30 = vand.u32 4294901760, %v2128_v29 }
 0x2ac   :  { %3980 = vmatprep.subr.bf16.mxu1 %v4162_v63 }
 0x2af   :  { %3982 = vmatpush3.bf16.msra.mxu1 %v3981_v15  ;;  %v2678_v15 = vand.u32 4294901760, %v2129_v32 }
 0x2b0   :  { %3983 = vmatprep.subr.bf16.mxu1 %v4162_v63 }
 0x2b1   :  { %v4041_v45 = vpack.c.bf16 %v2678_v15, %v2675_v30 }
 0x2b2   :  { %3676 = vmatmul.mubr.f32.vlgmr.msra.gmra.mrb[4].mxu1 %v4477_v3 }
 0x2b3   :  { %3985 = vmatpush3.bf16.msra.mxu1 %v3954_v10  ;;  %3686 = vmatprep.mubr.msk.f32.mxu1 %vm4163_vm1, %v4164_v13  ;;  %v2133_v13 = vld [vmem:[%s4581_s4 + $0x38] sm:$0xff] }
 0x2b4   :  { %3986 = vmatprep.subr.bf16.mxu1 %v4162_v63  ;;  %v2132_v63 = vld [vmem:[%s4581_s4 + $0x30] sm:$0xff]  ;;  %v2150_v40 = vand.u32 4294901760, %v2133_v13 }
 0x2b5   :  { %v2147_v31 = vand.u32 4294901760, %v2132_v63 }
 0x2b6   :  { %v2252_v50 = vsub.f32 %v2133_v13, %v2150_v40  ;;  %v2761_v13 = vsub.f32 %v2759_v35, %v2760_v37 }
 0x2b7   :  { %3988 = vmatpush3.bf16.msra.mxu1 %v3957_v17  ;;  %v4529_v47 = vpack.c.bf16 %v2150_v40, %v2147_v31  ;;  %v2245_v51 = vsub.f32 %v2132_v63, %v2147_v31  ;;  %v4037_v63 = vpack.c.bf16 %v2672_v46, %v2669_v43  ;;  %v2768_v31 = vsub.f32 %v2766_v22, %v2767_v24 }
 0x2b8   :  { %v2253_v56 = vand.u32 4294901760, %v2252_v50  ;;  %v2762_v48 = vand.u32 4294901760, %v2761_v13 }
 0x2b9   :  { %3994 = vmatprep.subr.bf16.mxu0 %v4529_v47  ;;  %v2246_v55 = vand.u32 4294901760, %v2245_v51  ;;  %v4009_v4 = vpack.c.bf16 %v2252_v50, %v2245_v51  ;;  %v2769_v49 = vand.u32 4294901760, %v2768_v31 }
 0x2ba   :  { %3687 = vmatmul.mubr.f32.vlgmr.msra.gmra.mrb[4].mxu1 %v4477_v3  ;;  %3996 = vmatpush3.bf16.msra.mxu0 %v4529_v47  ;;  %v2254_v61 = vsub.f32 %v2252_v50, %v2253_v56  ;;  %v4005_v3 = vpack.c.bf16 %v2238_v26, %v2231_v23  ;;  %v2773_v23 = vsub.f32 %v2128_v29, %v2675_v30 }
 0x2bb   :  { %v2247_v59 = vsub.f32 %v2245_v51, %v2246_v55  ;;  %3998 = vmatprep.subr.bf16.mxu0 %v3997_v57  ;;  %v4025_v6 = vpack.c.bf16 %v2253_v56, %v2246_v55  ;;  %v2780_v26 = vsub.f32 %v2129_v32, %v2678_v15 }
 0x2bc   :  { %v2255_v0 = vand.u32 4294901760, %v2254_v61  ;;  %v2774_v40 = vand.u32 4294901760, %v2773_v23 }
 0x2bd   :  { %v2248_v62 = vand.u32 4294901760, %v2247_v59  ;;  %v2781_v41 = vand.u32 4294901760, %v2780_v26  ;;  %v4057_v56 = vpack.c.bf16 %v2780_v26, %v2773_v23 }
 0x2be   :  { %v2775_v51 = vsub.f32 %v2773_v23, %v2774_v40 }
 0x2bf   :  { %v4001_v1 = vpack.c.bf16 %v2255_v0, %v2248_v62  ;;  %v2782_v50 = vsub.f32 %v2780_v26, %v2781_v41 }
 0x2c0   :  { %v2776_v53 = vand.u32 4294901760, %v2775_v51 }
 0x2c1   :  { %v2783_v54 = vand.u32 4294901760, %v2782_v50 }
 0x2c3   :  { %v4049_v55 = vpack.c.bf16 %v2783_v54, %v2776_v53 }
 0x35d   :  { %v1629_v8 = vpop.f32.mrb[2].mxu1 }
 0x35e   :  { %v2135_v9 = vsel %vm36_vm0, %v1629_v8, 0  ;;  %v3622_v10 = vpop.f32.mrb[3].mxu1 }
 0x35f   :  { %v2209_v11 = vand.u32 4294901760, %v2135_v9 }
 0x361   :  { %v2210_v12 = vsub.f32 %v2135_v9, %v2209_v11 }
 0x363   :  { %v2211_v14 = vand.u32 4294901760, %v2210_v12 }
 0x365   :  { %v2212_v16 = vsub.f32 %v2210_v12, %v2211_v14 }
 0x367   :  { %v2213_v60 = vand.u32 4294901760, %v2212_v16 }
 0x369   :  { %3697 = vmatprep.mubr.f32.mxu0 %v2213_v60 }
 0x38d   :  { %v2122_v17 = vpop.f32.mrb[4].mxu1 }
 0x38e   :  { %v2138_v18 = vsel %vm36_vm0, %v2122_v17, 0  ;;  %v3688_v19 = vpop.f32.mrb[5].mxu1 }
 0x38f   :  { %v2219_v20 = vand.u32 4294901760, %v2138_v18 }
 0x391   :  { %v2220_v21 = vsub.f32 %v2138_v18, %v2219_v20 }
 0x393   :  { %v2221_v7 = vand.u32 4294901760, %v2220_v21 }
 0x395   :  { %v2222_v25 = vsub.f32 %v2220_v21, %v2221_v7 }
 0x397   :  { %v2223_v28 = vand.u32 4294901760, %v2222_v25 }
 0x399   :  { %3698 = vmatmul.mubr.f32.vlgmr.msra.gmra.mrb[2].mxu0 %v2223_v28 }
 0x39a   :  { %4000 = vmatpush3.bf16.msra.mxu0 %v3997_v57  ;;  %3708 = vmatprep.mubr.f32.mxu0 %v2209_v11 }
 0x39b   :  { %4002 = vmatprep.subr.bf16.mxu0 %v4001_v1 }
 0x39e   :  { %4004 = vmatpush3.bf16.msra.mxu0 %v4001_v1 }
 0x39f   :  { %4006 = vmatprep.subr.bf16.mxu0 %v4005_v3 }
 0x3a1   :  { %3709 = vmatmul.mubr.f32.vlgmr.msra.gmra.mrb[2].mxu0 %v2219_v20 }
 0x3a2   :  { %4008 = vmatpush3.bf16.msra.mxu0 %v4005_v3  ;;  %3719 = vmatprep.mubr.f32.mxu0 %v2210_v12 }
 0x3a3   :  { %4010 = vmatprep.subr.bf16.mxu0 %v4009_v4 }
 0x3a6   :  { %4012 = vmatpush3.bf16.msra.mxu0 %v4009_v4 }
 0x3a7   :  { %4014 = vmatprep.subr.bf16.mxu0 %v4519_v39 }
 0x3a9   :  { %3720 = vmatmul.mubr.f32.vlgmr.msra.gmra.mrb[2].mxu0 %v2220_v21 }
 0x3aa   :  { %4016 = vmatpush3.bf16.msra.mxu0 %v4519_v39  ;;  %3730 = vmatprep.mubr.f32.mxu0 %v2211_v14 }
 0x3ab   :  { %4018 = vmatprep.subr.bf16.mxu0 %v4529_v47 }
 0x3ae   :  { %4020 = vmatpush3.bf16.msra.mxu0 %v4529_v47 }
 0x3af   :  { %4022 = vmatprep.subr.bf16.mxu0 %v4021_v5 }
 0x3b1   :  { %3731 = vmatmul.mubr.f32.vlgmr.msra.gmra.mrb[2].mxu0 %v2221_v7 }
 0x3b2   :  { %4024 = vmatpush3.bf16.msra.mxu0 %v4021_v5  ;;  %3741 = vmatprep.mubr.f32.mxu0 %v2209_v11 }
 0x3b3   :  { %4026 = vmatprep.subr.bf16.mxu0 %v4025_v6 }
 0x3b6   :  { %4028 = vmatpush3.bf16.msra.mxu0 %v4025_v6 }
 0x3b7   :  { %4030 = vmatprep.subr.bf16.mxu0 %v4519_v39 }
 0x3b9   :  { %3742 = vmatmul.mubr.f32.vlgmr.msra.gmra.mrb[2].mxu0 %v2219_v20 }
 0x3ba   :  { %4032 = vmatpush3.bf16.msra.mxu0 %v4519_v39  ;;  %3752 = vmatprep.mubr.f32.mxu0 %v2209_v11  ;;  %v4045_v39 = vpack.c.bf16 %v2769_v49, %v2762_v48 }
 0x3bb   :  { %4034 = vmatprep.subr.bf16.mxu0 %v4529_v47 }
 0x3be   :  { %4036 = vmatpush3.bf16.msra.mxu0 %v4529_v47  ;;  %v4053_v47 = vpack.c.bf16 %v2766_v22, %v2759_v35 }
 0x3bf   :  { %4038 = vmatprep.subr.bf16.mxu0 %v4037_v63 }
 0x3c1   :  { %3753 = vmatmul.mubr.f32.vlgmr.msra.gmra.mrb[2].mxu0 %v2219_v20 }
 0x3c2   :  { %4040 = vmatpush3.bf16.msra.mxu0 %v4037_v63  ;;  %3763 = vmatprep.mubr.f32.mxu0 %v4329_v58  ;;  %v4069_v58 = vpack.c.bf16 %v2767_v24, %v2760_v37 }
 0x3c3   :  { %4042 = vmatprep.subr.bf16.mxu0 %v4041_v45 }
 0x3c6   :  { %4044 = vmatpush3.bf16.msra.mxu0 %v4041_v45 }
 0x3c7   :  { %4046 = vmatprep.subr.bf16.mxu0 %v4045_v39 }
 0x3c9   :  { %3764 = vmatmul.mubr.f32.vlgmr.msra.gmra.mrb[2].mxu0 %v4341_v2  ;;  %v4073_v2 = vpack.c.bf16 %v2781_v41, %v2774_v40 }
 0x3ca   :  { %4048 = vmatpush3.bf16.msra.mxu0 %v4045_v39  ;;  %3774 = vmatprep.mubr.f32.mxu0 %v4262_v27 }
 0x3cb   :  { %4050 = vmatprep.subr.bf16.mxu0 %v4049_v55 }
 0x3ce   :  { %4052 = vmatpush3.bf16.msra.mxu0 %v4049_v55 }
 0x3cf   :  { %4054 = vmatprep.subr.bf16.mxu0 %v4053_v47 }
 0x3d1   :  { %3775 = vmatmul.mubr.f32.vlgmr.msra.gmra.mrb[2].mxu0 %v4283_v36 }
 0x3d2   :  { %4056 = vmatpush3.bf16.msra.mxu0 %v4053_v47  ;;  %3785 = vmatprep.mubr.f32.mxu0 %v4280_v34  ;;  %v3202_v34 = vpop.permute.xlu1 %3201 }
 0x3d3   :  { %4058 = vmatprep.subr.bf16.mxu0 %v4057_v56 }
 0x3d6   :  { %4060 = vmatpush3.bf16.msra.mxu0 %v4057_v56  ;;  %v3204_v59 = vpop.permute.xlu1 %3203 }
 0x3d7   :  { %4062 = vmatprep.subr.bf16.mxu0 %v4037_v63 }
 0x3d9   :  { %3786 = vmatmul.mubr.f32.vlgmr.msra.gmra.mrb[2].mxu0 %v4302_v44 }
 0x3da   :  { %4064 = vmatpush3.bf16.msra.mxu0 %v4037_v63  ;;  %3796 = vmatprep.mubr.f32.mxu0 %v4296_v42  ;;  %v3197_v42 = vpop.permute.xlu0 %3196 }
 0x3db   :  { %4066 = vmatprep.subr.bf16.mxu0 %v4041_v45 }
 0x3de   :  { %4068 = vmatpush3.bf16.msra.mxu0 %v4041_v45 }
 0x3df   :  { %4070 = vmatprep.subr.bf16.mxu0 %v4069_v58 }
 0x3e1   :  { %3797 = vmatmul.mubr.f32.vlgmr.msra.gmra.mrb[2].mxu0 %v4318_v52 }
 0x3e2   :  { %4072 = vmatpush3.bf16.msra.mxu0 %v4069_v58  ;;  %3807 = vmatprep.mubr.f32.mxu0 %v4262_v27 }
 0x3e3   :  { %4074 = vmatprep.subr.bf16.mxu0 %v4073_v2 }
 0x3e6   :  { %4076 = vmatpush3.bf16.msra.mxu0 %v4073_v2 }
 0x3e7   :  { %4078 = vmatprep.subr.bf16.mxu0 %v4037_v63 }
 0x3e9   :  { %3808 = vmatmul.mubr.f32.vlgmr.msra.gmra.mrb[2].mxu0 %v4283_v36 }
 0x3ea   :  { %4080 = vmatpush3.bf16.msra.mxu0 %v4037_v63  ;;  %3818 = vmatprep.mubr.f32.mxu0 %v4262_v27 }
 0x3eb   :  { %4082 = vmatprep.subr.bf16.mxu0 %v4041_v45 }
 0x3ee   :  { %4084 = vmatpush3.bf16.msra.mxu0 %v4041_v45 }
 0x3f1   :  { %3819 = vmatmul.mubr.f32.vlgmr.msra.gmra.mrb[2].mxu0 %v4283_v36 }
 0x4c4   :  { %v3820_v44 = vpop.f32.mrb[2].mxu0 }
 0x4c5   :  { %v3200_v52 = vadd.f32 %v3820_v44, %v3197_v42  ;;  %v3186_v57 = vpop.f32.mrb[3].mxu0 }
 0x4c6   :  { %v3199_v61 = vadd.f32 %v3197_v42, %v3186_v57 }
 0x4c7   :  { %v3208_v62 = vsel %vm36_vm0, %v3200_v52, %v3204_v59 }
 0x4c8   :  { %3211 = vst.msk [vmem:[%s4582_s6 + $0x8] sm:$0xff] %vm3209_vm2, %v3208_v62  ;;  %v3207_v27 = vsel %vm36_vm0, %v3199_v61, %v3202_v34 }
 0x4c9   :  { %3210 = vst.msk [vmem:[%s4582_s6] sm:$0xff] %vm3209_vm2, %v3207_v27 }

</bundles_post_ra>
